<compile_context>
chip_gen: v7x
topology: tpu7x:2x2x1
jax: 0.10.0
libtpu: 0.0.40
codegen_flags: <defaults>
</compile_context>

<pallas_src>
import functools

import jax
import jax.numpy as jnp
from jax.experimental import pallas as pl
from jax.experimental.pallas import tpu as pltpu


def _round_up(x, m):
    return (x + m - 1) // m * m


def _cdiv(a, b):
    return -(-a // b)


# ==========================================================================
# Pallas kernel 1: fused 3x3 conv + folded-BN (+ ReLU)
#   Input slab is stride-parity decomposed in the wrapper, so every one of
#   the 9 taps is a unit-stride static window of the VMEM-resident slab.
# ==========================================================================
def _conv3x3_bn_kernel(x_ref, w_ref, scale_ref, shift_ref, o_ref,
                       *, k, stride, Ho, Wo, apply_relu):
    # x_ref:  (1, s*s, Hs, Ws, Cin)  bf16  (parity-decomposed padded slab)
    # w_ref:  (k, k, Cin, tn)        bf16
    # scale/shift: (1, tn)           f32
    # o_ref:  (1, Ho*Wo, tn)
    nhw = Ho * Wo
    cin = x_ref.shape[-1]
    tn = o_ref.shape[-1]
    acc = jnp.zeros((nhw, tn), jnp.float32)
    for kh in range(k):
        for kw in range(k):
            ph, oh = kh % stride, kh // stride
            pw, ow = kw % stride, kw // stride
            xs = x_ref[0, ph * stride + pw, oh:oh + Ho, ow:ow + Wo, :]
            xs = xs.reshape(nhw, cin)
            acc = acc + jnp.dot(xs, w_ref[kh, kw],
                                preferred_element_type=jnp.float32)
    out = acc * scale_ref[...] + shift_ref[...]
    if apply_relu:
        out = jnp.maximum(out, 0.0)
    o_ref[0] = out.astype(o_ref.dtype)


# ==========================================================================
# Pallas kernel 2: tiled matmul + folded-BN (+ ReLU)
#   Used for the 1x1 downsample conv and as im2col fallback for huge slabs.
# ==========================================================================
def _matmul_bn_kernel(p_ref, w_ref, scale_ref, shift_ref, o_ref, acc_ref,
                      *, apply_relu):
    @pl.when(pl.program_id(2) == 0)
    def _():
        acc_ref[...] = jnp.zeros_like(acc_ref)

    acc_ref[...] += jnp.dot(p_ref[...], w_ref[...],
                            preferred_element_type=jnp.float32)

    @pl.when(pl.program_id(2) == pl.num_programs(2) - 1)
    def _():
        out = acc_ref[...] * scale_ref[...] + shift_ref[...]
        if apply_relu:
            out = jnp.maximum(out, 0.0)
        o_ref[...] = out.astype(o_ref.dtype)


def matmul_bn(p, w, scale, shift, apply_relu, out_dtype=jnp.float32,
              keep_padded_cout=False):
    """(M,K)x(K,Cout) matmul + folded-BN epilogue; bf16 MXU, f32 accumulate."""
    M, K = p.shape
    Cout = w.shape[1]

    # K tiling: tk is a multiple of 128 that divides Kp exactly (no wasteful
    # re-rounding of Kp to a fixed 512).
    Kp = _round_up(K, 128)
    nk = _cdiv(Kp, 2048)
    tk = 128 * _cdiv(Kp // 128, nk)
    Kp = tk * nk

    # Cout tiling: lane-dense output (multiple of 128).
    Coutp = _round_up(Cout, 128)
    tn = 256 if Coutp % 256 == 0 else 128

    # M tiling: large tiles; guarantee >=2 parallel grid steps (v7x dual TC).
    tm = min(512, _round_up(M, 16))
    Mp = _round_up(M, tm)
    if (Mp // tm) * (Coutp // tn) < 2 and M > 16:
        tm = _round_up(_cdiv(M, 2), 16)
        Mp = _round_up(M, tm)

    pp = jnp.pad(p.astype(jnp.bfloat16), ((0, Mp - M), (0, Kp - K)))
    wp = jnp.pad(w.astype(jnp.bfloat16), ((0, Kp - K), (0, Coutp - Cout)))
    sc = jnp.pad(scale.astype(jnp.float32), (0, Coutp - Cout)).reshape(1, Coutp)
    sh = jnp.pad(shift.astype(jnp.float32), (0, Coutp - Cout)).reshape(1, Coutp)

    grid = (Mp // tm, Coutp // tn, Kp // tk)
    kernel = functools.partial(_matmul_bn_kernel, apply_relu=apply_relu)
    out = pl.pallas_call(
        kernel,
        out_shape=jax.ShapeDtypeStruct((Mp, Coutp), out_dtype),
        grid=grid,
        in_specs=[
            pl.BlockSpec((tm, tk), lambda i, j, k: (i, k)),
            pl.BlockSpec((tk, tn), lambda i, j, k: (k, j)),
            pl.BlockSpec((1, tn), lambda i, j, k: (0, j)),
            pl.BlockSpec((1, tn), lambda i, j, k: (0, j)),
        ],
        out_specs=pl.BlockSpec((tm, tn), lambda i, j, k: (i, j)),
        scratch_shapes=[pltpu.VMEM((tm, tn), jnp.float32)],
        compiler_params=pltpu.CompilerParams(
            dimension_semantics=("parallel", "parallel", "arbitrary"),
            vmem_limit_bytes=48 * 1024 * 1024,
        ),
    )(pp, wp, sc, sh)
    out = out[:M]
    if not keep_padded_cout:
        out = out[:, :Cout]
    return out


# ==========================================================================
# Pallas kernel 3: SimAM attention + residual add + ReLU (lane-dense)
# ==========================================================================
def _simam_residual_kernel(y_ref, r_ref, o_ref, *, lambda_p, hw):
    y = y_ref[...].astype(jnp.float32)      # (nb, HW, Cp)
    r = r_ref[...].astype(jnp.float32)
    mean = jnp.sum(y, axis=1, keepdims=True) * (1.0 / hw)       # (nb,1,Cp)
    d = (y - mean) ** 2
    v = jnp.sum(d, axis=1, keepdims=True) * (1.0 / (hw - 1))    # (nb,1,Cp)
    e_inv = d / (4.0 * (v + lambda_p)) + 0.5
    att = 1.0 / (1.0 + jnp.exp(-e_inv))     # exact sigmoid (exp on EUP)
    out = y * att + r
    o_ref[...] = jnp.maximum(out, 0.0).astype(o_ref.dtype)


def simam_residual(y, res, lambda_p=1e-4):
    """y: (N, HW, Cp) f32 conv2 output; res: (N, HW, Cp) bf16 residual.
    Cp is a multiple of 128 with exactly-zero padded channels."""
    N, HW, Cp = y.shape
    # per-image VMEM: double-buffered y(f32)+res(bf16)+out(f32) + ~3 f32 temps
    per_img = HW * Cp * (2 * (4 + 2 + 4) + 12)
    nb = max(1, min(N, (8 * 1024 * 1024) // max(per_img, 1)))
    if N >= 2:
        nb = min(nb, max(1, N // 2))     # >=2 grid steps -> both v7x TCs busy
    grid = (_cdiv(N, nb),)
    kernel = functools.partial(_simam_residual_kernel,
                               lambda_p=lambda_p, hw=HW)
    spec = pl.BlockSpec((nb, HW, Cp), lambda n: (n, 0, 0))
    return pl.pallas_call(
        kernel,
        out_shape=jax.ShapeDtypeStruct((N, HW, Cp), jnp.float32),
        grid=grid,
        in_specs=[spec, spec],
        out_specs=spec,
        compiler_params=pltpu.CompilerParams(
            dimension_semantics=("parallel",),
            vmem_limit_bytes=48 * 1024 * 1024,
        ),
    )(y, res)


# ==========================================================================
# Wrappers (plain-JAX glue): BN folding, conv drivers, forward pass
# ==========================================================================
def _bn_affine(gamma, beta, mean, var, eps=1e-5):
    scale = gamma / jnp.sqrt(var + eps)
    shift = beta - mean * scale
    return scale, shift


def _conv_im2col_bn(x_nhwc, w_oihw, scale, shift, stride, apply_relu,
                    out_dtype):
    """Fallback path for very large spatial slabs (patch tensor in bf16)."""
    N, H, W, Cin = x_nhwc.shape
    Cout, _, k, _ = w_oihw.shape
    pad = 1
    xp = jnp.pad(x_nhwc.astype(jnp.bfloat16),
                 ((0, 0), (pad, pad), (pad, pad), (0, 0)))
    Ho = (H + 2 * pad - k) // stride + 1
    Wo = (W + 2 * pad - k) // stride + 1
    cols = []
    for kh in range(k):
        for kw in range(k):
            cols.append(
                xp[:, kh:kh + stride * Ho:stride, kw:kw + stride * Wo:stride, :])
    p = jnp.concatenate(cols, axis=-1).reshape(N * Ho * Wo, k * k * Cin)
    wm = jnp.transpose(w_oihw, (2, 3, 1, 0)).reshape(k * k * Cin, Cout)
    out = matmul_bn(p, wm, scale, shift, apply_relu, out_dtype=out_dtype,
                    keep_padded_cout=True)
    return out.reshape(N, Ho * Wo, out.shape[1])


def conv3x3_bn(x_nhwc, w_oihw, bn_params, stride, apply_relu, out_dtype):
    """3x3 conv (pad=1, stride in {1,2}) + folded BN (+ReLU).
    Returns ((N, Ho*Wo, Coutp), (Ho, Wo)) with Coutp = round_up(Cout, 128) and
    padded channels exactly zero."""
    N, H, W, Cin = x_nhwc.shape
    Cout, _, k, _ = w_oihw.shape
    pad = 1
    Ho = (H + 2 * pad - k) // stride + 1
    Wo = (W + 2 * pad - k) // stride + 1
    scale, shift = _bn_affine(*bn_params)

    Coutp = _round_up(Cout, 128)
    tn = 256 if Coutp % 256 == 0 else 128

    # --- stride-parity decomposition of the padded input (bf16) ------------
    xp = jnp.pad(x_nhwc.astype(jnp.bfloat16),
                 ((0, 0), (pad, pad), (pad, pad), (0, 0)))
    max_off = (k - 1) // stride
    Hs, Ws = Ho + max_off, Wo + max_off
    subs = []
    for ph in range(stride):
        for pw in range(stride):
            sub = xp[:, ph::stride, pw::stride, :][:, :Hs, :Ws, :]
            sub = jnp.pad(sub, ((0, 0), (0, Hs - sub.shape[1]),
                                (0, Ws - sub.shape[2]), (0, 0)))
            subs.append(sub)
    xd = jnp.stack(subs, axis=1)                      # (N, s*s, Hs, Ws, Cin)

    wm = jnp.transpose(w_oihw, (2, 3, 1, 0))          # (k,k,Cin,Cout)
    wm = jnp.pad(wm, ((0, 0), (0, 0), (0, 0),
                      (0, Coutp - Cout))).astype(jnp.bfloat16)
    sc = jnp.pad(scale.astype(jnp.float32), (0, Coutp - Cout)).reshape(1, Coutp)
    sh = jnp.pad(shift.astype(jnp.float32), (0, Coutp - Cout)).reshape(1, Coutp)

    HWo = Ho * Wo
    out_isz = jnp.dtype(out_dtype).itemsize
    est = (2 * (stride * stride * Hs * Ws * Cin * 2 + k * k * Cin * tn * 2
                + HWo * tn * out_isz)
           + HWo * tn * 4 + k * k * HWo * Cin * 2)
    if est > 24 * 1024 * 1024:
        # TODO(synk): H-tiled halo-DMA fused conv; fall back to im2col here.
        return (_conv_im2col_bn(x_nhwc, w_oihw, scale, shift, stride,
                                apply_relu, out_dtype), (Ho, Wo))

    kernel = functools.partial(_conv3x3_bn_kernel, k=k, stride=stride,
                               Ho=Ho, Wo=Wo, apply_relu=apply_relu)
    out = pl.pallas_call(
        kernel,
        out_shape=jax.ShapeDtypeStruct((N, HWo, Coutp), out_dtype),
        grid=(N, Coutp // tn),
        in_specs=[
            pl.BlockSpec((1, stride * stride, Hs, Ws, Cin),
                         lambda n, j: (n, 0, 0, 0, 0)),
            pl.BlockSpec((k, k, Cin, tn), lambda n, j: (0, 0, 0, j)),
            pl.BlockSpec((1, tn), lambda n, j: (0, j)),
            pl.BlockSpec((1, tn), lambda n, j: (0, j)),
        ],
        out_specs=pl.BlockSpec((1, HWo, tn), lambda n, j: (n, 0, j)),
        compiler_params=pltpu.CompilerParams(
            dimension_semantics=("parallel", "parallel"),
            vmem_limit_bytes=48 * 1024 * 1024,
        ),
    )(xd, wm, sc, sh)
    return out, (Ho, Wo)


def conv1x1_bn(x_nhwc, w_oihw, bn_params, stride, out_dtype):
    """1x1 conv (pad=0) + folded BN, returns (N, Ho*Wo, Coutp) channel-padded."""
    N, H, W, Cin = x_nhwc.shape
    Cout = w_oihw.shape[0]
    scale, shift = _bn_affine(*bn_params)
    xs = x_nhwc[:, ::stride, ::stride, :]
    Ho, Wo = xs.shape[1], xs.shape[2]
    p = xs.reshape(N * Ho * Wo, Cin).astype(jnp.bfloat16)
    wm = jnp.transpose(w_oihw.reshape(Cout, Cin), (1, 0))
    out = matmul_bn(p, wm, scale, shift, apply_relu=False,
                    out_dtype=out_dtype, keep_padded_cout=True)
    return out.reshape(N, Ho * Wo, out.shape[1])


def init_params(key, in_planes, planes, stride):
    ks = jax.random.split(key, 16)

    def bn_init(k, c):
        k1, k2, k3, k4 = jax.random.split(k, 4)
        gamma = 1.0 + 0.1 * jax.random.normal(k1, (c,), jnp.float32)
        beta = 0.1 * jax.random.normal(k2, (c,), jnp.float32)
        mean = 0.1 * jax.random.normal(k3, (c,), jnp.float32)
        var = 1.0 + 0.1 * jnp.abs(jax.random.normal(k4, (c,), jnp.float32))
        return (gamma, beta, mean, var)

    params = {
        "conv1_w": 0.1 * jax.random.normal(ks[0], (planes, in_planes, 3, 3),
                                           jnp.float32),
        "bn1": bn_init(ks[1], planes),
        "conv2_w": 0.1 * jax.random.normal(ks[2], (planes, planes, 3, 3),
                                           jnp.float32),
        "bn2": bn_init(ks[3], planes),
    }
    if stride != 1 or in_planes != planes:
        params["conv_ds_w"] = 0.1 * jax.random.normal(
            ks[4], (planes, in_planes, 1, 1), jnp.float32)
        params["bn_ds"] = bn_init(ks[5], planes)
    return params


def simam_basic_block_forward(x_nchw, params, stride):
    x = jnp.transpose(x_nchw, (0, 2, 3, 1))          # NCHW -> NHWC
    N, H, W, Cin = x.shape
    planes = params["conv1_w"].shape[0]

    # conv1 (3x3, stride) + BN + ReLU -> bf16 (feeds conv2's slab)
    y1, (H1, W1) = conv3x3_bn(x, params["conv1_w"], params["bn1"], stride,
                              apply_relu=True, out_dtype=jnp.bfloat16)
    y1_img = y1[:, :, :planes].reshape(N, H1, W1, planes)

    # conv2 (3x3, stride=1) + BN -> f32, channel-padded for lane-dense SimAM
    y2, (H2, W2) = conv3x3_bn(y1_img, params["conv2_w"], params["bn2"], 1,
                              apply_relu=False, out_dtype=jnp.float32)
    Cp = y2.shape[-1]

    # residual branch (bf16, channel-padded to Cp with exact zeros)
    if "conv_ds_w" in params:
        res = conv1x1_bn(x, params["conv_ds_w"], params["bn_ds"], stride,
                         out_dtype=jnp.bfloat16)
        if res.shape[-1] != Cp:   # defensive; planes match so this is a no-op
            res = jnp.pad(res, ((0, 0), (0, 0), (0, Cp - res.shape[-1])))
    else:
        res = x.reshape(N, H * W, Cin).astype(jnp.bfloat16)
        res = jnp.pad(res, ((0, 0), (0, 0), (0, Cp - Cin)))

    out = simam_residual(y2, res)                     # (N, H2*W2, Cp) f32
    out = out[:, :, :planes].reshape(N, H2, W2, planes)
    return jnp.transpose(out, (0, 3, 1, 2))           # NHWC -> NCHW


# ==========================================================================
# Pure-JAX f32 reference (same semantics as the PyTorch forward, inference BN)
# ==========================================================================
def reference_forward(x_nchw, params, stride):
    x = jnp.transpose(x_nchw, (0, 2, 3, 1))

    def conv(xx, w_oihw, s, pad):
        w_hwio = jnp.transpose(w_oihw, (2, 3, 1, 0))
        return jax.lax.conv_general_dilated(
            xx, w_hwio, (s, s), [(pad, pad), (pad, pad)],
            dimension_numbers=("NHWC", "HWIO", "NHWC"))

    def bn(y, p):
        g, b, m, v = p
        return (y - m) / jnp.sqrt(v + 1e-5) * g + b

    out = jax.nn.relu(bn(conv(x, params["conv1_w"], stride, 1), params["bn1"]))
    out = bn(conv(out, params["conv2_w"], 1, 1), params["bn2"])
    H, W = out.shape[1], out.shape[2]
    n = H * W - 1
    d = (out - jnp.mean(out, axis=(1, 2), keepdims=True)) ** 2
    v = jnp.sum(d, axis=(1, 2), keepdims=True) / n
    e_inv = d / (4.0 * (v + 1e-4)) + 0.5
    out = out * jax.nn.sigmoid(e_inv)
    if "conv_ds_w" in params:
        res = bn(conv(x, params["conv_ds_w"], stride, 0), params["bn_ds"])
    else:
        res = x
    out = jax.nn.relu(out + res)
    return jnp.transpose(out, (0, 3, 1, 2))


# ==========================================================================
if __name__ == "__main__":
    key = jax.random.PRNGKey(0)

    # ---- case 1: stride=2 with downsample branch -------------------------
    B, in_planes, planes, H, W = 2, 4, 8, 16, 16
    stride = 2
    kx, kp, kx2, kp2 = jax.random.split(key, 4)
    x = jax.random.normal(kx, (B, in_planes, H, W), jnp.float32)   # NCHW
    params = init_params(kp, in_planes, planes, stride)

    out = jax.block_until_ready(simam_basic_block_forward(x, params, stride))
    ref = jax.block_until_ready(reference_forward(x, params, stride))
    assert out.shape == (B, planes, H // stride, W // stride), out.shape
    err1 = float(jnp.max(jnp.abs(out - ref)))
    assert jnp.allclose(out, ref, rtol=5e-2, atol=5e-2), err1

    # ---- case 2: stride=1 identity-residual branch ------------------------
    in_planes2 = planes2 = 8
    x2 = jax.random.normal(kx2, (B, in_planes2, H, W), jnp.float32)
    params2 = init_params(kp2, in_planes2, planes2, 1)
    out2 = jax.block_until_ready(simam_basic_block_forward(x2, params2, 1))
    ref2 = jax.block_until_ready(reference_forward(x2, params2, 1))
    assert out2.shape == (B, planes2, H, W), out2.shape
    err2 = float(jnp.max(jnp.abs(out2 - ref2)))
    assert jnp.allclose(out2, ref2, rtol=5e-2, atol=5e-2), err2

    print("KERNEL_OK")
</pallas_src>

<mosaic_0001>
module attributes {stable_mosaic.version = 11 : i64} {
  func.func @_conv3x3_bn_kernel(%arg0: i32, %arg1: i32, %arg2: memref<1x4x9x9x4xbf16, #tpu.memory_space<vmem>>, %arg3: memref<3x3x4x128xbf16, #tpu.memory_space<vmem>>, %arg4: memref<1x128xf32, #tpu.memory_space<vmem>>, %arg5: memref<1x128xf32, #tpu.memory_space<vmem>>, %arg6: memref<1x64x128xbf16, #tpu.memory_space<vmem>>) attributes {dimension_semantics = [#tpu.dimension_semantics<parallel>, #tpu.dimension_semantics<parallel>], iteration_bounds = array<i64: 2, 1>, scalar_prefetch = 0 : i64, scratch_operands = 0 : i64, tpu.core_type = #tpu.core_type<tc>, window_params = [{transform_indices = @transform_0, window_bounds = array<i64: 1, 4, 9, 9, 4>}, {transform_indices = @transform_1, window_bounds = array<i64: 3, 3, 4, 128>}, {transform_indices = @transform_2, window_bounds = array<i64: 1, 128>}, {transform_indices = @transform_3, window_bounds = array<i64: 1, 128>}, {transform_indices = @transform_4, window_bounds = array<i64: 1, 64, 128>}]} {
    %cst = arith.constant 0.000000e+00 : f32
    %0 = vector.broadcast %cst : f32 to vector<64x128xf32>
    %c0 = arith.constant 0 : index
    %c0_0 = arith.constant 0 : index
    %c0_1 = arith.constant 0 : index
    %c0_2 = arith.constant 0 : index
    %c0_3 = arith.constant 0 : index
    %1 = vector.load %arg2[%c0, %c0_0, %c0_1, %c0_2, %c0_3] : memref<1x4x9x9x4xbf16, #tpu.memory_space<vmem>>, vector<1x1x8x8x4xbf16>
    %2 = vector.shape_cast %1 : vector<1x1x8x8x4xbf16> to vector<8x8x4xbf16>
    %3 = vector.shape_cast %2 : vector<8x8x4xbf16> to vector<64x4xbf16>
    %c0_4 = arith.constant 0 : index
    %c0_5 = arith.constant 0 : index
    %c0_6 = arith.constant 0 : index
    %c0_7 = arith.constant 0 : index
    %4 = vector.load %arg3[%c0_4, %c0_5, %c0_6, %c0_7] : memref<3x3x4x128xbf16, #tpu.memory_space<vmem>>, vector<1x1x4x128xbf16>
    %5 = vector.shape_cast %4 : vector<1x1x4x128xbf16> to vector<4x128xbf16>
    %cst_8 = arith.constant dense<0.000000e+00> : vector<64x128xf32>
    %6 = tpu.matmul %3, %5, %cst_8 {dimension_numbers = #tpu.dot_dimension_numbers<[1], [0], [0], [1], [0, 0, 1, 1], [], []>} : vector<64x4xbf16>, vector<4x128xbf16>, vector<64x128xf32> -> vector<64x128xf32>
    %7 = arith.addf %0, %6 : vector<64x128xf32>
    %c0_9 = arith.constant 0 : index
    %c1 = arith.constant 1 : index
    %c0_10 = arith.constant 0 : index
    %c0_11 = arith.constant 0 : index
    %c0_12 = arith.constant 0 : index
    %8 = vector.load %arg2[%c0_9, %c1, %c0_10, %c0_11, %c0_12] : memref<1x4x9x9x4xbf16, #tpu.memory_space<vmem>>, vector<1x1x8x8x4xbf16>
    %9 = vector.shape_cast %8 : vector<1x1x8x8x4xbf16> to vector<8x8x4xbf16>
    %10 = vector.shape_cast %9 : vector<8x8x4xbf16> to vector<64x4xbf16>
    %c0_13 = arith.constant 0 : index
    %c1_14 = arith.constant 1 : index
    %c0_15 = arith.constant 0 : index
    %c0_16 = arith.constant 0 : index
    %11 = vector.load %arg3[%c0_13, %c1_14, %c0_15, %c0_16] : memref<3x3x4x128xbf16, #tpu.memory_space<vmem>>, vector<1x1x4x128xbf16>
    %12 = vector.shape_cast %11 : vector<1x1x4x128xbf16> to vector<4x128xbf16>
    %cst_17 = arith.constant dense<0.000000e+00> : vector<64x128xf32>
    %13 = tpu.matmul %10, %12, %cst_17 {dimension_numbers = #tpu.dot_dimension_numbers<[1], [0], [0], [1], [0, 0, 1, 1], [], []>} : vector<64x4xbf16>, vector<4x128xbf16>, vector<64x128xf32> -> vector<64x128xf32>
    %14 = arith.addf %7, %13 : vector<64x128xf32>
    %c0_18 = arith.constant 0 : index
    %c0_19 = arith.constant 0 : index
    %c0_20 = arith.constant 0 : index
    %c1_21 = arith.constant 1 : index
    %c0_22 = arith.constant 0 : index
    %15 = vector.load %arg2[%c0_18, %c0_19, %c0_20, %c1_21, %c0_22] : memref<1x4x9x9x4xbf16, #tpu.memory_space<vmem>>, vector<1x1x8x8x4xbf16>
    %16 = vector.shape_cast %15 : vector<1x1x8x8x4xbf16> to vector<8x8x4xbf16>
    %17 = vector.shape_cast %16 : vector<8x8x4xbf16> to vector<64x4xbf16>
    %c0_23 = arith.constant 0 : index
    %c2 = arith.constant 2 : index
    %c0_24 = arith.constant 0 : index
    %c0_25 = arith.constant 0 : index
    %18 = vector.load %arg3[%c0_23, %c2, %c0_24, %c0_25] : memref<3x3x4x128xbf16, #tpu.memory_space<vmem>>, vector<1x1x4x128xbf16>
    %19 = vector.shape_cast %18 : vector<1x1x4x128xbf16> to vector<4x128xbf16>
    %cst_26 = arith.constant dense<0.000000e+00> : vector<64x128xf32>
    %20 = tpu.matmul %17, %19, %cst_26 {dimension_numbers = #tpu.dot_dimension_numbers<[1], [0], [0], [1], [0, 0, 1, 1], [], []>} : vector<64x4xbf16>, vector<4x128xbf16>, vector<64x128xf32> -> vector<64x128xf32>
    %21 = arith.addf %14, %20 : vector<64x128xf32>
    %c0_27 = arith.constant 0 : index
    %c2_28 = arith.constant 2 : index
    %c0_29 = arith.constant 0 : index
    %c0_30 = arith.constant 0 : index
    %c0_31 = arith.constant 0 : index
    %22 = vector.load %arg2[%c0_27, %c2_28, %c0_29, %c0_30, %c0_31] : memref<1x4x9x9x4xbf16, #tpu.memory_space<vmem>>, vector<1x1x8x8x4xbf16>
    %23 = vector.shape_cast %22 : vector<1x1x8x8x4xbf16> to vector<8x8x4xbf16>
    %24 = vector.shape_cast %23 : vector<8x8x4xbf16> to vector<64x4xbf16>
    %c1_32 = arith.constant 1 : index
    %c0_33 = arith.constant 0 : index
    %c0_34 = arith.constant 0 : index
    %c0_35 = arith.constant 0 : index
    %25 = vector.load %arg3[%c1_32, %c0_33, %c0_34, %c0_35] : memref<3x3x4x128xbf16, #tpu.memory_space<vmem>>, vector<1x1x4x128xbf16>
    %26 = vector.shape_cast %25 : vector<1x1x4x128xbf16> to vector<4x128xbf16>
    %cst_36 = arith.constant dense<0.000000e+00> : vector<64x128xf32>
    %27 = tpu.matmul %24, %26, %cst_36 {dimension_numbers = #tpu.dot_dimension_numbers<[1], [0], [0], [1], [0, 0, 1, 1], [], []>} : vector<64x4xbf16>, vector<4x128xbf16>, vector<64x128xf32> -> vector<64x128xf32>
    %28 = arith.addf %21, %27 : vector<64x128xf32>
    %c0_37 = arith.constant 0 : index
    %c3 = arith.constant 3 : index
    %c0_38 = arith.constant 0 : index
    %c0_39 = arith.constant 0 : index
    %c0_40 = arith.constant 0 : index
    %29 = vector.load %arg2[%c0_37, %c3, %c0_38, %c0_39, %c0_40] : memref<1x4x9x9x4xbf16, #tpu.memory_space<vmem>>, vector<1x1x8x8x4xbf16>
    %30 = vector.shape_cast %29 : vector<1x1x8x8x4xbf16> to vector<8x8x4xbf16>
    %31 = vector.shape_cast %30 : vector<8x8x4xbf16> to vector<64x4xbf16>
    %c1_41 = arith.constant 1 : index
    %c1_42 = arith.constant 1 : index
    %c0_43 = arith.constant 0 : index
    %c0_44 = arith.constant 0 : index
    %32 = vector.load %arg3[%c1_41, %c1_42, %c0_43, %c0_44] : memref<3x3x4x128xbf16, #tpu.memory_space<vmem>>, vector<1x1x4x128xbf16>
    %33 = vector.shape_cast %32 : vector<1x1x4x128xbf16> to vector<4x128xbf16>
    %cst_45 = arith.constant dense<0.000000e+00> : vector<64x128xf32>
    %34 = tpu.matmul %31, %33, %cst_45 {dimension_numbers = #tpu.dot_dimension_numbers<[1], [0], [0], [1], [0, 0, 1, 1], [], []>} : vector<64x4xbf16>, vector<4x128xbf16>, vector<64x128xf32> -> vector<64x128xf32>
    %35 = arith.addf %28, %34 : vector<64x128xf32>
    %c0_46 = arith.constant 0 : index
    %c2_47 = arith.constant 2 : index
    %c0_48 = arith.constant 0 : index
    %c1_49 = arith.constant 1 : index
    %c0_50 = arith.constant 0 : index
    %36 = vector.load %arg2[%c0_46, %c2_47, %c0_48, %c1_49, %c0_50] : memref<1x4x9x9x4xbf16, #tpu.memory_space<vmem>>, vector<1x1x8x8x4xbf16>
    %37 = vector.shape_cast %36 : vector<1x1x8x8x4xbf16> to vector<8x8x4xbf16>
    %38 = vector.shape_cast %37 : vector<8x8x4xbf16> to vector<64x4xbf16>
    %c1_51 = arith.constant 1 : index
    %c2_52 = arith.constant 2 : index
    %c0_53 = arith.constant 0 : index
    %c0_54 = arith.constant 0 : index
    %39 = vector.load %arg3[%c1_51, %c2_52, %c0_53, %c0_54] : memref<3x3x4x128xbf16, #tpu.memory_space<vmem>>, vector<1x1x4x128xbf16>
    %40 = vector.shape_cast %39 : vector<1x1x4x128xbf16> to vector<4x128xbf16>
    %cst_55 = arith.constant dense<0.000000e+00> : vector<64x128xf32>
    %41 = tpu.matmul %38, %40, %cst_55 {dimension_numbers = #tpu.dot_dimension_numbers<[1], [0], [0], [1], [0, 0, 1, 1], [], []>} : vector<64x4xbf16>, vector<4x128xbf16>, vector<64x128xf32> -> vector<64x128xf32>
    %42 = arith.addf %35, %41 : vector<64x128xf32>
    %c0_56 = arith.constant 0 : index
    %c0_57 = arith.constant 0 : index
    %c1_58 = arith.constant 1 : index
    %c0_59 = arith.constant 0 : index
    %c0_60 = arith.constant 0 : index
    %43 = vector.load %arg2[%c0_56, %c0_57, %c1_58, %c0_59, %c0_60] : memref<1x4x9x9x4xbf16, #tpu.memory_space<vmem>>, vector<1x1x8x8x4xbf16>
    %44 = vector.shape_cast %43 : vector<1x1x8x8x4xbf16> to vector<8x8x4xbf16>
    %45 = vector.shape_cast %44 : vector<8x8x4xbf16> to vector<64x4xbf16>
    %c2_61 = arith.constant 2 : index
    %c0_62 = arith.constant 0 : index
    %c0_63 = arith.constant 0 : index
    %c0_64 = arith.constant 0 : index
    %46 = vector.load %arg3[%c2_61, %c0_62, %c0_63, %c0_64] : memref<3x3x4x128xbf16, #tpu.memory_space<vmem>>, vector<1x1x4x128xbf16>
    %47 = vector.shape_cast %46 : vector<1x1x4x128xbf16> to vector<4x128xbf16>
    %cst_65 = arith.constant dense<0.000000e+00> : vector<64x128xf32>
    %48 = tpu.matmul %45, %47, %cst_65 {dimension_numbers = #tpu.dot_dimension_numbers<[1], [0], [0], [1], [0, 0, 1, 1], [], []>} : vector<64x4xbf16>, vector<4x128xbf16>, vector<64x128xf32> -> vector<64x128xf32>
    %49 = arith.addf %42, %48 : vector<64x128xf32>
    %c0_66 = arith.constant 0 : index
    %c1_67 = arith.constant 1 : index
    %c1_68 = arith.constant 1 : index
    %c0_69 = arith.constant 0 : index
    %c0_70 = arith.constant 0 : index
    %50 = vector.load %arg2[%c0_66, %c1_67, %c1_68, %c0_69, %c0_70] : memref<1x4x9x9x4xbf16, #tpu.memory_space<vmem>>, vector<1x1x8x8x4xbf16>
    %51 = vector.shape_cast %50 : vector<1x1x8x8x4xbf16> to vector<8x8x4xbf16>
    %52 = vector.shape_cast %51 : vector<8x8x4xbf16> to vector<64x4xbf16>
    %c2_71 = arith.constant 2 : index
    %c1_72 = arith.constant 1 : index
    %c0_73 = arith.constant 0 : index
    %c0_74 = arith.constant 0 : index
    %53 = vector.load %arg3[%c2_71, %c1_72, %c0_73, %c0_74] : memref<3x3x4x128xbf16, #tpu.memory_space<vmem>>, vector<1x1x4x128xbf16>
    %54 = vector.shape_cast %53 : vector<1x1x4x128xbf16> to vector<4x128xbf16>
    %cst_75 = arith.constant dense<0.000000e+00> : vector<64x128xf32>
    %55 = tpu.matmul %52, %54, %cst_75 {dimension_numbers = #tpu.dot_dimension_numbers<[1], [0], [0], [1], [0, 0, 1, 1], [], []>} : vector<64x4xbf16>, vector<4x128xbf16>, vector<64x128xf32> -> vector<64x128xf32>
    %56 = arith.addf %49, %55 : vector<64x128xf32>
    %c0_76 = arith.constant 0 : index
    %c0_77 = arith.constant 0 : index
    %c1_78 = arith.constant 1 : index
    %c1_79 = arith.constant 1 : index
    %c0_80 = arith.constant 0 : index
    %57 = vector.load %arg2[%c0_76, %c0_77, %c1_78, %c1_79, %c0_80] : memref<1x4x9x9x4xbf16, #tpu.memory_space<vmem>>, vector<1x1x8x8x4xbf16>
    %58 = vector.shape_cast %57 : vector<1x1x8x8x4xbf16> to vector<8x8x4xbf16>
    %59 = vector.shape_cast %58 : vector<8x8x4xbf16> to vector<64x4xbf16>
    %c2_81 = arith.constant 2 : index
    %c2_82 = arith.constant 2 : index
    %c0_83 = arith.constant 0 : index
    %c0_84 = arith.constant 0 : index
    %60 = vector.load %arg3[%c2_81, %c2_82, %c0_83, %c0_84] : memref<3x3x4x128xbf16, #tpu.memory_space<vmem>>, vector<1x1x4x128xbf16>
    %61 = vector.shape_cast %60 : vector<1x1x4x128xbf16> to vector<4x128xbf16>
    %cst_85 = arith.constant dense<0.000000e+00> : vector<64x128xf32>
    %62 = tpu.matmul %59, %61, %cst_85 {dimension_numbers = #tpu.dot_dimension_numbers<[1], [0], [0], [1], [0, 0, 1, 1], [], []>} : vector<64x4xbf16>, vector<4x128xbf16>, vector<64x128xf32> -> vector<64x128xf32>
    %63 = arith.addf %56, %62 : vector<64x128xf32>
    %c0_86 = arith.constant 0 : index
    %c0_87 = arith.constant 0 : index
    %64 = vector.load %arg4[%c0_86, %c0_87] : memref<1x128xf32, #tpu.memory_space<vmem>>, vector<1x128xf32>
    %65 = vector.broadcast %64 : vector<1x128xf32> to vector<64x128xf32>
    %66 = arith.mulf %63, %65 : vector<64x128xf32>
    %c0_88 = arith.constant 0 : index
    %c0_89 = arith.constant 0 : index
    %67 = vector.load %arg5[%c0_88, %c0_89] : memref<1x128xf32, #tpu.memory_space<vmem>>, vector<1x128xf32>
    %68 = vector.broadcast %67 : vector<1x128xf32> to vector<64x128xf32>
    %69 = arith.addf %66, %68 : vector<64x128xf32>
    %cst_90 = arith.constant 0.000000e+00 : f32
    %70 = vector.broadcast %cst_90 : f32 to vector<64x128xf32>
    %71 = arith.maximumf %69, %70 : vector<64x128xf32>
    %72 = arith.truncf %71 : vector<64x128xf32> to vector<64x128xbf16>
    %c0_91 = arith.constant 0 : index
    %c0_92 = arith.constant 0 : index
    %c0_93 = arith.constant 0 : index
    %73 = vector.load %arg6[%c0_91, %c0_92, %c0_93] : memref<1x64x128xbf16, #tpu.memory_space<vmem>>, vector<1x64x128xbf16>
    %74 = vector.shape_cast %73 : vector<1x64x128xbf16> to vector<64x128xbf16>
    %75 = vector.shape_cast %72 : vector<64x128xbf16> to vector<1x64x128xbf16>
    tpu.vector_store %arg6[%c0_91, %c0_92, %c0_93], %75 {strides = array<i32>} : memref<1x64x128xbf16, #tpu.memory_space<vmem>>, vector<1x64x128xbf16>,
    return
  }
  func.func @transform_0(%arg0: i32, %arg1: i32) -> (i32, i32, i32, i32, i32) {
    %c0_i32 = arith.constant 0 : i32
    %c0_i32_0 = arith.constant 0 : i32
    %c0_i32_1 = arith.constant 0 : i32
    %c0_i32_2 = arith.constant 0 : i32
    %c0_i32_3 = arith.constant 0 : i32
    return %arg0, %c0_i32, %c0_i32_0, %c0_i32_1, %c0_i32_2 : i32, i32, i32, i32, i32
  }
  func.func @transform_1(%arg0: i32, %arg1: i32) -> (i32, i32, i32, i32) {
    %c0_i32 = arith.constant 0 : i32
    %c0_i32_0 = arith.constant 0 : i32
    %c0_i32_1 = arith.constant 0 : i32
    %c0_i32_2 = arith.constant 0 : i32
    return %c0_i32, %c0_i32_0, %c0_i32_1, %arg1 : i32, i32, i32, i32
  }
  func.func @transform_2(%arg0: i32, %arg1: i32) -> (i32, i32) {
    %c0_i32 = arith.constant 0 : i32
    %c0_i32_0 = arith.constant 0 : i32
    return %c0_i32, %arg1 : i32, i32
  }
  func.func @transform_3(%arg0: i32, %arg1: i32) -> (i32, i32) {
    %c0_i32 = arith.constant 0 : i32
    %c0_i32_0 = arith.constant 0 : i32
    return %c0_i32, %arg1 : i32, i32
  }
  func.func @transform_4(%arg0: i32, %arg1: i32) -> (i32, i32, i32) {
    %c0_i32 = arith.constant 0 : i32
    %c0_i32_0 = arith.constant 0 : i32
    return %arg0, %c0_i32, %arg1 : i32, i32, i32
  }
}

</mosaic_0001>

<bundles_post_ra>
// kernel: tpu_custom_call.1
= control target key start
LH: loop header
LB: loop body
LE: loop exit
PB: predicated region body
PF: predicated region fallthrough
CT: control target
= control target key end

     0   :  { %9 = vsyncpa [#allocation3], 0  ;;  %s2823_s0 = inlined_call_operand.vmem [shape: bf16[2,4,9,9,4], index: 0, kind: input, shape index: {}]   ;;  %s2824_s1 = inlined_call_operand.vmem [shape: bf16[3,3,4,128], index: 1, kind: input, shape index: {}]   ;;  %s2825_s2 = inlined_call_operand.vmem [shape: f32[1,128], index: 2, kind: input, shape index: {}]   ;;  %s2826_s3 = inlined_call_operand.vmem [shape: f32[1,128], index: 3, kind: input, shape index: {}]   ;;  %s2827_s4 = inlined_call_operand.hbm [shape: bf16[2,64,128], index: 4, kind: output, shape index: {}]  }
   0x1   :  { %11 = vsyncpa [#allocation3 + $0x1], 0  ;;  %s2461_s15 = smov 0   ;;  %s2463_s16 = smov 0  }
   0x2   :  { %s2465_s17 = smov 0   ;;  %s2467_s18 = smov 0  }
   0x3   :  { %s2469_s19 = smov 0   ;;  %s2471_s20 = smov 0  }
   0x4 LB: > { %s1851_s21 = sadd.s32 4294967295, %s2431_s20   ;;  %s1852_s22 = sadd.s32 4294967294, %s2431_s20   ;;  %s2431_s20 = sphi %s2471_s20, %s17_s20   ;;  %s2427_s19 = sphi %s2469_s19, %s2836_s19   ;;  %s2423_s18 = sphi %s2467_s18, %s2835_s18   ;;  %s2419_s17 = sphi %s2465_s17, %s2834_s17   ;;  %s2415_s16 = sphi %s2463_s16, %s2833_s16   ;;  %s2411_s15 = sphi %s2461_s15, %s2832_s15  }
   0x5   : > { %s29_s23 = sadd.s32 1, %s2427_s19  ;;  %s142_s24 = sadd.s32 1, %s2419_s17 }
   0x6   : > { %p31_p0 = scmp.ge.s32.totalorder %s29_s23, 2  ;;  %p152_p1 = scmp.ne.s32.totalorder %s2419_s17, %s2415_s16 }
   0x7   : > { %p153_p2 = scmp.eq.s32.totalorder %s1851_s21, 1  ;;  %p158_p3 = scmp.ne.s32.totalorder %s2415_s16, %s2411_s15 }
   0x8   : > { %s2838_s23 = smov (%p31_p0, %s29_s23), 0  ;;  %p159_p5 = scmp.eq.s32.totalorder %s1852_s22, 1 }
   0x9   : > { %p2501_p4 = por %p153_p2, %p152_p1  ;;  %s137_s26 = ssub.s32 %s2427_s19, %s2838_s23 }
   0xa   : > { %p1858_p6 = scmp.ge.s32.totalorder %s2431_s20, 1  ;;  %p140_p7 = scmp.eq.s32.totalorder %s137_s26, 0 }
   0xb   : > { %p2508_p8 = por %p159_p5, %p158_p3  ;;  %p204_p9 = scmp.lt.s32.totalorder %s2431_s20, 3 }
   0xc   : > { %s2514_s28 = scalar_select %p140_p7, %s2419_s17, %s142_s24  }
   0xd   : > { %p205_p10 = pnand %p1858_p6, %p204_p9 }
   0xe   : > { %v1869_v0 = vld [vmem:[%s2824_s1 + $0x2] sm:$0x3] (!%p205_p10)  ;;  %vm309_vm0 = vcmask (!%p205_p10), 1041408   ;;  %v2522_v1 = vld [vmem:[%s2824_s1 + $0x8] sm:$0x3] (!%p205_p10)  ;;  %p240_p11 = scmp.lt.s32.totalorder (!%p205_p10), %s2423_s18, 1 }
   0xf   : > { %208 = sbr.rel (%p205_p10) target bundleno = 344 (0x158), region = 36  ;;  %2261 = vmatprep.subr.msk.bf16.mxu1 (!%p205_p10), %vm309_vm0, %v1869_v0  ;;  %2265 = vmatprep.subr.msk.bf16.mxu0 (!%p205_p10), %vm309_vm0, %v2522_v1  ;;  %v311_v2 = vsel (!%p205_p10), %vm309_vm0, %v1869_v0, 0  ;;  %v2531_v3 = vsel (!%p205_p10), %vm309_vm0, %v2522_v1, 0  ;;  %v264_v4 = vld [vmem:[%s2824_s1] sm:$0x3] (!%p205_p10)  ;;  %vm296_vm1 = vcmask (!%p205_p10), 31744  }
  0x10   : > { %2106 = vmatpush3.bf16.msra.mxu1 (!%p205_p10), %v311_v2  ;;  %2146 = vmatpush3.bf16.msra.mxu0 (!%p205_p10), %v2531_v3  ;;  %v1945_v5 = vld [vmem:[%s2824_s1 + $0xa] sm:$0x3] (!%p205_p10)  ;;  %v411_v6 = vsel (!%p205_p10), %vm309_vm0, %v264_v4, 0  ;;  %v1962_v9 = vld [vmem:[%s2824_s1 + $0xc] sm:$0x3] (!%p205_p10)  ;;  %s237_s14 = sand.u32 (!%p205_p10), 1, %s2415_s16  }
  0x11   : > { %2262 = vmatprep.subr.msk.bf16.mxu1 (!%p205_p10), %vm309_vm0, %v264_v4  ;;  %2267 = vmatprep.subr.msk.bf16.mxu0 (!%p205_p10), %vm309_vm0, %v1945_v5  ;;  %v1104_v7 = vsel (!%p205_p10), %vm309_vm0, %v1945_v5, 0  ;;  %v1886_v10 = vld [vmem:[%s2824_s1 + $0x4] sm:$0x3] (!%p205_p10)  ;;  %vm494_vm2 = vsmask.f32 (!%p205_p10), 3328  ;;  %v2566_v15 = vsel (!%p205_p10), %vm309_vm0, %v1962_v9, 0 }
  0x12   : > { %vm495_vm3 = vsmask.f32 (!%p205_p10), 7440  ;;  %v2569_v16 = vsel (!%p205_p10), %vm309_vm0, %v1886_v10, 0  ;;  %s2036_s24 = sshll.u32 (!%p205_p10), %s2423_s18, 9  ;;  %s2433_s7 = smov (!%p205_p10), [#allocation2]  }
  0x13   : > { %vm2586_vm4 = vmor (!%p205_p10), %vm494_vm2, %vm495_vm3  ;;  %s2771_s5 = scalar_lea.hbm (!%p205_p10), %s2827_s4, %s2036_s24  ;;  %s2357_s8 = sshll.u32 (!%p205_p10), %s2433_s7, 4  ;;  %s2358_s8 = int_to_ptr.vmem [resolvable:$false] %s2357_s8 }
  0x16   : > { %s241_s9 = scalar_select %p240_p11, %s2423_s18, 1 }
  0x17   : > { %s2777_s18 = scalar_lea.sflag [#allocation3], %s237_s14 }
  0x18   : > { %s2271_s12 = smul.u32 288, %s241_s9  ;;  %s2359_s9 = scalar_lea.vmem %s2358_s8, 1024 }
  0x1a   : > { %s2546_s21 = scalar_lea.vmem %s2823_s0, %s2271_s12 }
  0x1b   : > { %v2329_v8 = vld [vmem:[%s2546_s21 + $0x48] ss:$8 sps:$4 sm:$0xff]   ;;  %v2330_v11 = vld [vmem:[%s2546_s21 + $0xd8] ss:$8 sps:$4 sm:$0xff]   ;;  %v1930_v19 = vld [vmem:[%s2546_s21 + $0x94] sm:$0x1] }
  0x1c   : > { %2107 = vmatprep.mubr.msk.bf16.mxu1 %vm296_vm1, %v2329_v8  ;;  %v2331_v12 = vld [vmem:[%s2546_s21 + $0x58] ss:$8 sps:$4 sm:$0xff]   ;;  %2147 = vmatprep.mubr.msk.bf16.mxu0 %vm296_vm1, %v2330_v11  ;;  %v2332_v13 = vld [vmem:[%s2546_s21 + $0xe8] ss:$8 sps:$4 sm:$0xff]   ;;  %v1932_v21 = vld [vmem:[%s2546_s21 + $0x9c] sm:$0x1] }
  0x1d   : > { %2108 = vmatmul.mubr.msk.bf16.vlgmr.msra.gmra.mrb[0].mxu1 %vm296_vm1, %v2331_v12  ;;  %v2333_v14 = vld [vmem:[%s2546_s21 + $0x68] ss:$8 sps:$4 sm:$0xff]   ;;  %2148 = vmatmul.mubr.msk.bf16.vlgmr.msra.gmra.mrb[0].mxu0 %vm296_vm1, %v2332_v13  ;;  %v2334_v17 = vld [vmem:[%s2546_s21 + $0x78] ss:$8 sps:$4 sm:$0xff]   ;;  %v975_v24 = vshll.u32 %v1930_v19, 16  ;;  %v989_v27 = vshll.u32 %v1932_v21, 16 }
  0x1e   : > { %2116 = vmatpush3.bf16.msra.mxu1 %v411_v6  ;;  %2156 = vmatpush3.bf16.msra.mxu0 %v1104_v7  ;;  %v1929_v18 = vld [vmem:[%s2546_s21 + $0x90] sm:$0xf]  ;;  %v1931_v20 = vld [vmem:[%s2546_s21 + $0x98] sm:$0xf]  ;;  %v1933_v28 = vld [vmem:[%s2546_s21 + $0xa0] sm:$0xf] }
  0x1f   : > { %2111 = vmatprep.mubr.msk.bf16.mxu1 %vm296_vm1, %v2333_v14  ;;  %v966_v22 = vshrl.u32 %v1929_v18, 16  ;;  %v969_v23 = vshll.u32 %v1929_v18, 16  ;;  %v980_v25 = vshrl.u32 %v1931_v20, 16  ;;  %2268 = vmatprep.subr.msk.bf16.mxu0 %vm309_vm0, %v1962_v9  ;;  %v983_v26 = vshll.u32 %v1931_v20, 16  ;;  %v1934_v29 = vld [vmem:[%s2546_s21 + $0xa4] sm:$0x1] }
  0x20   : > { %2263 = vmatprep.subr.msk.bf16.mxu1 %vm309_vm0, %v1886_v10  ;;  %v977_v32 = vrot.slane %v975_v24, 5  ;;  %v1935_v34 = vld [vmem:[%s2546_s21 + $0xa8] sm:$0xf]  ;;  %v991_v36 = vrot.slane %v989_v27, 5  ;;  %v1936_v37 = vld [vmem:[%s2546_s21 + $0xac] sm:$0x1] }
  0x21   : > { %v968_v30 = vrot.slane %v966_v22, 4  ;;  %v971_v31 = vrot.slane %v969_v23, 5  ;;  %v982_v33 = vrot.slane %v980_v25, 4  ;;  %v985_v35 = vrot.slane %v983_v26, 5  ;;  %v2335_v53 = vld [vmem:[%s2546_s21] ss:$8 sps:$4 sm:$0xff]  }
  0x22   : > { %v994_v38 = vshrl.u32 %v1933_v28, 16  ;;  %v997_v39 = vshll.u32 %v1933_v28, 16  ;;  %v1003_v41 = vshll.u32 %v1934_v29, 16  ;;  %v1008_v42 = vshrl.u32 %v1935_v34, 16  ;;  %v2336_v59 = vld [vmem:[%s2546_s21 + $0x10] ss:$8 sps:$4 sm:$0xff]  }
  0x23   : > { %v972_v40 = vor.u32 %v971_v31, %v968_v30  ;;  %v1011_v43 = vshll.u32 %v1935_v34, 16  ;;  %v986_v45 = vor.u32 %v985_v35, %v982_v33  ;;  %v1017_v48 = vshll.u32 %v1936_v37, 16  ;;  %v1937_v60 = vld [vmem:[%s2546_s21 + $0xb0] sm:$0xf]  ;;  %v1938_v61 = vld [vmem:[%s2546_s21 + $0xb4] sm:$0x1] }
  0x24   : > { %v996_v46 = vrot.slane %v994_v38, 4  ;;  %v999_v47 = vrot.slane %v997_v39, 5  ;;  %v1005_v50 = vrot.slane %v1003_v41, 5  ;;  %v1010_v51 = vrot.slane %v1008_v42, 4  ;;  %v1939_v0 = vld [vmem:[%s2546_s21 + $0xb8] sm:$0xf] }
  0x25   : > { %2112 = vmatmul.mubr.msk.bf16.gmra.mrb[4].mxu1 %vm296_vm1, %v2334_v17  ;;  %v973_v49 = vrot.slane %v972_v40, 4  ;;  %v1013_v52 = vrot.slane %v1011_v43, 5  ;;  %v987_v54 = vrot.slane %v986_v45, 4  ;;  %v1019_v56 = vrot.slane %v1017_v48, 5  ;;  %v1940_v2 = vld [vmem:[%s2546_s21 + $0xbc] sm:$0x1] }
  0x26   : > { %v1000_v55 = vor.u32 %v999_v47, %v996_v46  ;;  %2117 = vmatprep.mubr.msk.bf16.mxu1 %vm296_vm1, %v2335_v53  ;;  %v1022_v4 = vshrl.u32 %v1937_v60, 16  ;;  %v1025_v7 = vshll.u32 %v1937_v60, 16  ;;  %v1031_v8 = vshll.u32 %v1938_v61, 16  ;;  %v1941_v9 = vld [vmem:[%s2546_s21 + $0xc0] sm:$0xf] }
  0x27   : > { %v978_v57 = vsel %vm2586_vm4, %v973_v49, %v977_v32  ;;  %v1014_v58 = vor.u32 %v1013_v52, %v1010_v51  ;;  %v992_v62 = vsel %vm2586_vm4, %v987_v54, %v991_v36  ;;  %v2605_v10 = vld [vmem:[%s2824_s1 + $0x6] sm:$0x3]  ;;  %v1036_v13 = vshrl.u32 %v1939_v0, 16  ;;  %v1942_v17 = vld [vmem:[%s2546_s21 + $0xc4] sm:$0x1] }
  0x28   : > { %v1001_v63 = vrot.slane %v1000_v55, 4  ;;  %v1946_v5 = vcombine.low %v978_v57, %v992_v62  ;;  %v1024_v12 = vrot.slane %v1022_v4, 4  ;;  %v1039_v14 = vshll.u32 %v1939_v0, 16  ;;  %v1943_v22 = vld [vmem:[%s2546_s21 + $0xc8] sm:$0xf] }
  0x29   : > { %v1015_v6 = vrot.slane %v1014_v58, 4  ;;  %v1027_v19 = vrot.slane %v1025_v7, 5  ;;  %v1033_v20 = vrot.slane %v1031_v8, 5  ;;  %v1045_v21 = vshll.u32 %v1940_v2, 16  ;;  %v2617_v23 = vld [vmem:[%s2824_s1 + $0xe] sm:$0x3] }
  0x2a   : > { %v1006_v11 = vsel %vm2586_vm4, %v1001_v63, %v1005_v50  ;;  %2157 = vmatprep.mubr.msk.bf16.mxu0 %vm296_vm1, %v1946_v5  ;;  %v1038_v25 = vrot.slane %v1036_v13, 4  ;;  %v1041_v26 = vrot.slane %v1039_v14, 5  ;;  %v1944_v27 = vld [vmem:[%s2546_s21 + $0xcc] sm:$0x1]  ;;  %v1050_v28 = vshrl.u32 %v1941_v9, 16 }
  0x2b   : > { %v1020_v18 = vsel %vm2586_vm4, %v1015_v6, %v1019_v56  ;;  %v1028_v29 = vor.u32 %v1027_v19, %v1024_v12  ;;  %v1047_v30 = vrot.slane %v1045_v21, 5  ;;  %v1053_v31 = vshll.u32 %v1941_v9, 16  ;;  %v2339_v53 = vld [vmem:[%s2546_s21 + $0x8] ss:$8 sps:$4 sm:$0xff]   ;;  %v478_v54 = vld [vmem:[%s2546_s21] sm:$0xf] }
  0x2c   : > { %v1947_v24 = vcombine.low %v1006_v11, %v1020_v18  ;;  %v1059_v32 = vshll.u32 %v1942_v17, 16  ;;  %v1042_v33 = vor.u32 %v1041_v26, %v1038_v25  ;;  %v1052_v34 = vrot.slane %v1050_v28, 4  ;;  %v479_v56 = vld [vmem:[%s2546_s21 + $0x4] sm:$0x1]  ;;  %v480_v57 = vld [vmem:[%s2546_s21 + $0x8] sm:$0xf] }
  0x2d   : > { %2118 = vmatmul.mubr.msk.bf16.vlgmr.msra.gmra.mrb[0].mxu1 %vm296_vm1, %v2336_v59  ;;  %v1064_v35 = vshrl.u32 %v1943_v22, 16  ;;  %v1067_v36 = vshll.u32 %v1943_v22, 16  ;;  %v1029_v37 = vrot.slane %v1028_v29, 4  ;;  %v1055_v38 = vrot.slane %v1053_v31, 5  ;;  %v481_v58 = vld [vmem:[%s2546_s21 + $0xc] sm:$0x1] }
  0x2e   : > { %2126 = vmatpush3.bf16.msra.mxu1 %v2569_v16  ;;  %2158 = vmatmul.mubr.msk.bf16.vlgmr.msra.gmra.mrb[0].mxu0 %vm296_vm1, %v1947_v24  ;;  %v1073_v39 = vshll.u32 %v1944_v27, 16  ;;  %v2337_v16 = vld [vmem:[%s2546_s21 + $0x20] ss:$8 sps:$4 sm:$0xff]   ;;  %v1043_v40 = vrot.slane %v1042_v33, 4  ;;  %v1061_v46 = vrot.slane %v1059_v32, 5  ;;  %v498_v60 = vshrl.u32 %v478_v54, 16 }
  0x2f   : > { %2264 = vmatprep.subr.msk.bf16.mxu1 %vm309_vm0, %v2605_v10  ;;  %2166 = vmatpush3.bf16.msra.mxu0 %v2566_v15  ;;  %v1066_v41 = vrot.slane %v1064_v35, 4  ;;  %v1069_v42 = vrot.slane %v1067_v36, 5  ;;  %v1034_v43 = vsel %vm2586_vm4, %v1029_v37, %v1033_v20  ;;  %v1056_v45 = vor.u32 %v1055_v38, %v1052_v34  ;;  %v2338_v15 = vld [vmem:[%s2546_s21 + $0x30] ss:$8 sps:$4 sm:$0xff]   ;;  %v483_v6 = vld [vmem:[%s2546_s21 + $0x14] sm:$0x1] }
  0x30   : > { %2269 = vmatprep.subr.msk.bf16.mxu0 %vm309_vm0, %v2617_v23  ;;  %2121 = vmatprep.mubr.msk.bf16.mxu1 %vm296_vm1, %v2337_v16  ;;  %v1048_v47 = vsel %vm2586_vm4, %v1043_v40, %v1047_v30  ;;  %v1075_v49 = vrot.slane %v1073_v39, 5  ;;  %v501_v61 = vshll.u32 %v478_v54, 16  ;;  %v507_v62 = vshll.u32 %v479_v56, 16  ;;  %v482_v63 = vld [vmem:[%s2546_s21 + $0x10] sm:$0xf] }
  0x31   : > { %v1070_v48 = vor.u32 %v1069_v42, %v1066_v41  ;;  %v1948_v50 = vcombine.low %v1034_v43, %v1048_v47  ;;  %v1057_v51 = vrot.slane %v1056_v45, 4  ;;  %v512_v2 = vshrl.u32 %v480_v57, 16  ;;  %v484_v11 = vld [vmem:[%s2546_s21 + $0x18] sm:$0xf]  ;;  %v485_v18 = vld [vmem:[%s2546_s21 + $0x1c] sm:$0x1] }
  0x32   : > { %v515_v4 = vshll.u32 %v480_v57, 16  ;;  %v521_v5 = vshll.u32 %v481_v58, 16  ;;  %v500_v7 = vrot.slane %v498_v60, 4  ;;  %v503_v8 = vrot.slane %v501_v61, 5  ;;  %v2340_v29 = vld [vmem:[%s2546_s21 + $0x18] ss:$8 sps:$4 sm:$0xff]  }
  0x33   : > { %v1071_v52 = vrot.slane %v1070_v48, 4  ;;  %2161 = vmatprep.mubr.msk.bf16.mxu0 %vm296_vm1, %v1948_v50  ;;  %v1062_v55 = vsel %vm2586_vm4, %v1057_v51, %v1061_v46  ;;  %v509_v9 = vrot.slane %v507_v62, 5  ;;  %v526_v12 = vshrl.u32 %v482_v63, 16  ;;  %v2341_v37 = vld [vmem:[%s2546_s21 + $0x28] ss:$8 sps:$4 sm:$0xff]  }
  0x34   : > { %v514_v13 = vrot.slane %v512_v2, 4  ;;  %v517_v14 = vrot.slane %v515_v4, 5  ;;  %v523_v17 = vrot.slane %v521_v5, 5  ;;  %v529_v19 = vshll.u32 %v482_v63, 16  ;;  %v486_v40 = vld [vmem:[%s2546_s21 + $0x20] sm:$0xf] }
  0x35   : > { %2122 = vmatmul.mubr.msk.bf16.gmra.mrb[4].mxu1 %vm296_vm1, %v2338_v15  ;;  %v1076_v59 = vsel %vm2586_vm4, %v1071_v52, %v1075_v49  ;;  %v504_v20 = vor.u32 %v503_v8, %v500_v7  ;;  %v528_v21 = vrot.slane %v526_v12, 4  ;;  %v535_v22 = vshll.u32 %v483_v6, 16  ;;  %v487_v45 = vld [vmem:[%s2546_s21 + $0x24] sm:$0x1]  ;;  %v488_v46 = vld [vmem:[%s2546_s21 + $0x28] sm:$0xf] }
  0x36   : > { %v1949_v0 = vcombine.low %v1062_v55, %v1076_v59  ;;  %v540_v24 = vshrl.u32 %v484_v11, 16  ;;  %v518_v25 = vor.u32 %v517_v14, %v514_v13  ;;  %v531_v26 = vrot.slane %v529_v19, 5  ;;  %v489_v48 = vld [vmem:[%s2546_s21 + $0x2c] sm:$0x1]  ;;  %v490_v55 = vld [vmem:[%s2546_s21 + $0x30] sm:$0xf] }
  0x37   : > { %v543_v27 = vshll.u32 %v484_v11, 16  ;;  %v549_v28 = vshll.u32 %v485_v18, 16  ;;  %v1342_v30 = vsel %vm309_vm0, %v2617_v23, 0  ;;  %v505_v31 = vrot.slane %v504_v20, 4  ;;  %v2664_v23 = vld [vmem:[%s2824_s1 + $0x10] sm:$0x3] }
  0x38   : > { %2162 = vmatmul.mubr.msk.bf16.gmra.mrb[4].mxu0 %vm296_vm1, %v1949_v0  ;;  %v537_v32 = vrot.slane %v535_v22, 5  ;;  %v542_v33 = vrot.slane %v540_v24, 4  ;;  %v519_v34 = vrot.slane %v518_v25, 4  ;;  %v532_v35 = vor.u32 %v531_v26, %v528_v21  ;;  %v491_v60 = vld [vmem:[%s2546_s21 + $0x34] sm:$0x1] }
  0x39   : > { %2167 = vmatprep.mubr.msk.bf16.mxu0 %vm296_vm1, %v2339_v53  ;;  %v545_v36 = vrot.slane %v543_v27, 5  ;;  %v510_v38 = vsel %vm2586_vm4, %v505_v31, %v509_v9  ;;  %v551_v39 = vrot.slane %v549_v28, 5  ;;  %v755_v16 = vsel %vm309_vm0, %v2605_v10, 0  ;;  %v2342_v62 = vld [vmem:[%s2546_s21 + $0x38] ss:$8 sps:$4 sm:$0xff]  }
  0x3a   : > { %v524_v41 = vsel %vm2586_vm4, %v519_v34, %v523_v17  ;;  %v533_v42 = vrot.slane %v532_v35, 4  ;;  %v554_v15 = vshrl.u32 %v486_v40, 16  ;;  %v557_v49 = vshll.u32 %v486_v40, 16  ;;  %v492_v0 = vld [vmem:[%s2546_s21 + $0x38] sm:$0xf] }
  0x3b   : > { %v546_v43 = vor.u32 %v545_v36, %v542_v33  ;;  %v1887_v47 = vcombine.low %v510_v38, %v524_v41  ;;  %v563_v10 = vshll.u32 %v487_v45, 16  ;;  %v568_v50 = vshrl.u32 %v488_v46, 16  ;;  %v493_v2 = vld [vmem:[%s2546_s21 + $0x3c] sm:$0x1]  ;;  %v2343_v14 = vld [vmem:[%s2546_s21 + $0x50] ss:$8 sps:$4 sm:$0xff]  }
  0x3c   : > { %v538_v51 = vsel %vm2586_vm4, %v533_v42, %v537_v32  ;;  %v556_v53 = vrot.slane %v554_v15, 4  ;;  %v571_v54 = vshll.u32 %v488_v46, 16  ;;  %v559_v56 = vrot.slane %v557_v49, 5  ;;  %v2344_v35 = vld [vmem:[%s2546_s21 + $0x60] ss:$8 sps:$4 sm:$0xff]  }
  0x3d   : > { %v547_v52 = vrot.slane %v546_v43, 4  ;;  %2127 = vmatprep.mubr.msk.bf16.mxu1 %vm296_vm1, %v1887_v47  ;;  %v565_v57 = vrot.slane %v563_v10, 5  ;;  %v570_v58 = vrot.slane %v568_v50, 4  ;;  %v577_v59 = vshll.u32 %v489_v48, 16  ;;  %v1989_v40 = vld [vmem:[%s2546_s21 + $0xc] sm:$0x1] }
  0x3e   : > { %v573_v63 = vrot.slane %v571_v54, 5  ;;  %v582_v4 = vshrl.u32 %v490_v55, 16  ;;  %v560_v6 = vor.u32 %v559_v56, %v556_v53  ;;  %v585_v8 = vshll.u32 %v490_v55, 16  ;;  %v1990_v41 = vld [vmem:[%s2546_s21 + $0x10] sm:$0xf] }
  0x3f   : > { %v552_v61 = vsel %vm2586_vm4, %v547_v52, %v551_v39  ;;  %v579_v7 = vrot.slane %v577_v59, 5  ;;  %v591_v12 = vshll.u32 %v491_v60, 16  ;;  %v596_v13 = vshrl.u32 %v492_v0, 16  ;;  %v2347_v39 = vld [vmem:[%s2546_s21 + $0x70] ss:$8 sps:$4 sm:$0xff]  }
  0x40   : > { %2168 = vmatmul.mubr.msk.bf16.vlgmr.msra.gmra.mrb[0].mxu0 %vm296_vm1, %v2340_v29  ;;  %v1888_v5 = vcombine.low %v538_v51, %v552_v61  ;;  %v574_v9 = vor.u32 %v573_v63, %v570_v58  ;;  %v584_v11 = vrot.slane %v582_v4, 4  ;;  %v561_v17 = vrot.slane %v560_v6, 4  ;;  %v1991_v42 = vld [vmem:[%s2546_s21 + $0x14] sm:$0x1]  ;;  %v1992_v48 = vld [vmem:[%s2546_s21 + $0x18] sm:$0xf] }
  0x41   : > { %2176 = vmatpush3.bf16.msra.mxu0 %v1342_v30  ;;  %2171 = vmatprep.mubr.msk.bf16.mxu0 %vm296_vm1, %v2341_v37  ;;  %v587_v18 = vrot.slane %v585_v8, 5  ;;  %v599_v19 = vshll.u32 %v492_v0, 16  ;;  %v605_v20 = vshll.u32 %v493_v2, 16  ;;  %v598_v22 = vrot.slane %v596_v13, 4  ;;  %v2345_v37 = vld [vmem:[%s2546_s21 + $0x90] ss:$8 sps:$4 sm:$0xff]  }
  0x42   : > { %2270 = vmatprep.subr.msk.bf16.mxu0 %vm309_vm0, %v2664_v23  ;;  %2128 = vmatmul.mubr.msk.bf16.vlgmr.msra.gmra.mrb[0].mxu1 %vm296_vm1, %v1888_v5  ;;  %v575_v21 = vrot.slane %v574_v9, 4  ;;  %v566_v24 = vsel %vm2586_vm4, %v561_v17, %v565_v57  ;;  %v593_v26 = vrot.slane %v591_v12, 5  ;;  %v1572_v34 = vsel %vm309_vm0, %v2664_v23, 0  ;;  %v1993_v50 = vld [vmem:[%s2546_s21 + $0x1c] sm:$0x1] }
  0x43   : > { %2136 = vmatpush3.bf16.msra.mxu1 %v755_v16  ;;  %v588_v25 = vor.u32 %v587_v18, %v584_v11  ;;  %v601_v27 = vrot.slane %v599_v19, 5  ;;  %v607_v32 = vrot.slane %v605_v20, 5  ;;  %v1988_v16 = vld [vmem:[%s2546_s21 + $0x8] sm:$0xf]  ;;  %v1443_v23 = vshll.u32 %v1989_v40, 16 }
  0x44   : > { %2266 = vmatprep.subr.msk.bf16.mxu1 %vm309_vm0, %v2522_v1  ;;  %v580_v28 = vsel %vm2586_vm4, %v575_v21, %v579_v7  ;;  %v1434_v43 = vshrl.u32 %v1988_v16, 16  ;;  %v1437_v45 = vshll.u32 %v1988_v16, 16  ;;  %v1448_v46 = vshrl.u32 %v1990_v41, 16  ;;  %v1994_v51 = vld [vmem:[%s2546_s21 + $0x20] sm:$0xf] }
  0x45   : > { %v1889_v29 = vcombine.low %v566_v24, %v580_v28  ;;  %v589_v30 = vrot.slane %v588_v25, 4  ;;  %v602_v31 = vor.u32 %v601_v27, %v598_v22  ;;  %v1451_v15 = vshll.u32 %v1990_v41, 16  ;;  %v2346_v52 = vld [vmem:[%s2546_s21 + $0xa0] ss:$8 sps:$4 sm:$0xff]   ;;  %v1995_v58 = vld [vmem:[%s2546_s21 + $0x24] sm:$0x1] }
  0x46   : > { %v1457_v47 = vshll.u32 %v1991_v42, 16  ;;  %v1436_v49 = vrot.slane %v1434_v43, 4  ;;  %v1439_v10 = vrot.slane %v1437_v45, 5  ;;  %v2348_v53 = vld [vmem:[%s2546_s21 + $0x80] ss:$8 sps:$4 sm:$0xff]   ;;  %v1445_v54 = vrot.slane %v1443_v23, 5 }
  0x47   : > { %2131 = vmatprep.mubr.msk.bf16.mxu1 %vm296_vm1, %v1889_v29  ;;  %v594_v1 = vsel %vm2586_vm4, %v589_v30, %v593_v26  ;;  %v603_v33 = vrot.slane %v602_v31, 4  ;;  %v1450_v55 = vrot.slane %v1448_v46, 4  ;;  %v1453_v56 = vrot.slane %v1451_v15, 5  ;;  %v2349_v5 = vld [vmem:[%s2546_s21 + $0xb0] ss:$8 sps:$4 sm:$0xff]  }
  0x48   : > { %2172 = vmatmul.mubr.msk.bf16.gmra.mrb[4].mxu0 %vm296_vm1, %v2342_v62  ;;  %v1459_v57 = vrot.slane %v1457_v47, 5  ;;  %v1440_v59 = vor.u32 %v1439_v10, %v1436_v49  ;;  %v1462_v60 = vshrl.u32 %v1992_v48, 16  ;;  %v1465_v61 = vshll.u32 %v1992_v48, 16  ;;  %v1996_v17 = vld [vmem:[%s2546_s21 + $0x28] sm:$0xf] }
  0x49   : > { %2177 = vmatprep.mubr.msk.bf16.mxu0 %vm296_vm1, %v2343_v14  ;;  %v608_v36 = vsel %vm2586_vm4, %v603_v33, %v607_v32  ;;  %v1471_v62 = vshll.u32 %v1993_v50, 16  ;;  %v1454_v63 = vor.u32 %v1453_v56, %v1450_v55  ;;  %v1476_v0 = vshrl.u32 %v1994_v51, 16  ;;  %v1997_v20 = vld [vmem:[%s2546_s21 + $0x2c] sm:$0x1]  ;;  %v1998_v21 = vld [vmem:[%s2546_s21 + $0x30] sm:$0xf] }
  0x4a   : > { %v1890_v38 = vcombine.low %v594_v1, %v608_v36  ;;  %v1479_v2 = vshll.u32 %v1994_v51, 16  ;;  %v1485_v4 = vshll.u32 %v1995_v58, 16  ;;  %v1441_v6 = vrot.slane %v1440_v59, 4  ;;  %v1999_v22 = vld [vmem:[%s2546_s21 + $0x34] sm:$0x1] }
  0x4b   : > { %v1464_v7 = vrot.slane %v1462_v60, 4  ;;  %v1467_v8 = vrot.slane %v1465_v61, 5  ;;  %v1473_v9 = vrot.slane %v1471_v62, 5  ;;  %v1455_v11 = vrot.slane %v1454_v63, 4  ;;  %v2350_v32 = vld [vmem:[%s2546_s21 + $0xc0] ss:$8 sps:$4 sm:$0xff]  }
  0x4c   : > { %2132 = vmatmul.mubr.msk.bf16.gmra.mrb[4].mxu1 %vm296_vm1, %v1890_v38  ;;  %v1478_v12 = vrot.slane %v1476_v0, 4  ;;  %v1481_v13 = vrot.slane %v1479_v2, 5  ;;  %v1487_v14 = vrot.slane %v1485_v4, 5  ;;  %v1446_v18 = vsel %vm2586_vm4, %v1441_v6, %v1445_v54  ;;  %v2000_v36 = vld [vmem:[%s2546_s21 + $0x38] sm:$0xf] }
  0x4d   : > { %2137 = vmatprep.mubr.msk.bf16.mxu1 %vm296_vm1, %v2345_v37  ;;  %v1468_v19 = vor.u32 %v1467_v8, %v1464_v7  ;;  %v1460_v24 = vsel %vm2586_vm4, %v1455_v11, %v1459_v57  ;;  %v1490_v26 = vshrl.u32 %v1996_v17, 16  ;;  %v1493_v27 = vshll.u32 %v1996_v17, 16  ;;  %v2001_v16 = vld [vmem:[%s2546_s21 + $0x3c] sm:$0x1]  ;;  %v2002_v43 = vld [vmem:[%s2546_s21 + $0x40] sm:$0xf] }
  0x4e   : > { %v1482_v25 = vor.u32 %v1481_v13, %v1478_v12  ;;  %v2005_v28 = vcombine.low %v1446_v18, %v1460_v24  ;;  %v1499_v30 = vshll.u32 %v1997_v20, 16  ;;  %v1504_v31 = vshrl.u32 %v1998_v21, 16  ;;  %v2003_v45 = vld [vmem:[%s2546_s21 + $0x44] sm:$0x1]  ;;  %v2351_v15 = vld [vmem:[%s2546_s21 + $0xf8] ss:$8 sps:$4 sm:$0xff]  }
  0x4f   : > { %v1469_v29 = vrot.slane %v1468_v19, 4  ;;  %v1492_v33 = vrot.slane %v1490_v26, 4  ;;  %v1518_v23 = vshrl.u32 %v2000_v36, 16  ;;  %v1521_v48 = vshll.u32 %v2000_v36, 16  ;;  %v2352_v8 = vld [vmem:[%s2546_s21 + $0x108] ss:$8 sps:$4 sm:$0xff]  }
  0x50   : > { %2178 = vmatmul.mubr.msk.bf16.vlgmr.msra.gmra.mrb[0].mxu0 %vm296_vm1, %v2344_v35  ;;  %v1483_v1 = vrot.slane %v1482_v25, 4  ;;  %v1507_v35 = vshll.u32 %v1998_v21, 16  ;;  %v1501_v37 = vrot.slane %v1499_v30, 5  ;;  %v1506_v38 = vrot.slane %v1504_v31, 4  ;;  %v2013_v18 = vld [vmem:[%s2825_s2] ss:$0 sm:$0xff] }
  0x51   : > { %2186 = vmatpush3.bf16.msra.mxu0 %v1572_v34  ;;  %2181 = vmatprep.mubr.msk.bf16.mxu0 %vm296_vm1, %v2347_v39  ;;  %v1495_v34 = vrot.slane %v1493_v27, 5  ;;  %v1513_v39 = vshll.u32 %v1999_v22, 16  ;;  %v1527_v49 = vshll.u32 %v2001_v16, 16  ;;  %v1520_v51 = vrot.slane %v1518_v23, 4  ;;  %v2014_v20 = vld [vmem:[%s2826_s3] ss:$0 sm:$0xff] }
  0x52   : > { %v1488_v40 = vsel %vm2586_vm4, %v1483_v1, %v1487_v14  ;;  %v1509_v42 = vrot.slane %v1507_v35, 5  ;;  %v1535_v54 = vshll.u32 %v2002_v43, 16  ;;  %v1541_v55 = vshll.u32 %v2003_v45, 16  ;;  %s1859_s21 = sshll.u32 %s237_s14, 5 }
  0x53   : > { %v1496_v41 = vor.u32 %v1495_v34, %v1492_v33  ;;  %v1515_v47 = vrot.slane %v1513_v39, 5  ;;  %v1529_v60 = vrot.slane %v1527_v49, 5  ;;  %s239_s22 = scalar_lea.vmem [#allocation2], %s1859_s21 }
  0x54   : > { %2138 = vmatmul.mubr.msk.bf16.vlgmr.msra.gmra.mrb[0].mxu1 %vm296_vm1, %v2346_v52  ;;  %v1510_v50 = vor.u32 %v1509_v42, %v1506_v38  ;;  %v1532_v52 = vshrl.u32 %v2002_v43, 16  ;;  %v1537_v61 = vrot.slane %v1535_v54, 5  ;;  %v1543_v4 = vrot.slane %v1541_v55, 5  ;;  %s1740_s26 = sshll.u32 %s239_s22, 4  ;;  %s2773_s26 = int_to_ptr.vmem [resolvable:$true] %s1740_s26 }
  0x55   : > { %2196 = vmatpush3.bf16.msra.mxu1 %v2531_v3  ;;  %2141 = vmatprep.mubr.msk.bf16.mxu1 %vm296_vm1, %v2349_v5  ;;  %v1474_v3 = vsel %vm2586_vm4, %v1469_v29, %v1473_v9  ;;  %v1497_v10 = vrot.slane %v1496_v41, 4  ;;  %s2353_s6 = scalar_lea.vmem %s2773_s26, 512  ;;  %p2360_p1 = scmp.lt.s32.totalorder %s2773_s26, %s2358_s8 }
  0x56   : > { %v2006_v46 = vcombine.low %v1474_v3, %v1488_v40  ;;  %v1511_v57 = vrot.slane %v1510_v50, 4  ;;  %v1534_v58 = vrot.slane %v1532_v52, 4  ;;  %p2354_p12 = scmp.ne.s32.totalorder %s2773_s26, %s2353_s6  ;;  %p2361_p2 = scmp.lt.s32.totalorder %s2359_s9, %s2353_s6 }
  0x57   : > { %v1502_v56 = vsel %vm2586_vm4, %v1497_v10, %v1501_v37 }
  0x58   : > { %2182 = vmatmul.mubr.msk.bf16.gmra.mrb[4].mxu0 %vm296_vm1, %v2348_v53  ;;  %v1523_v53 = vrot.slane %v1521_v48, 5  ;;  %v1516_v62 = vsel %vm2586_vm4, %v1511_v57, %v1515_v47  ;;  %v1538_v2 = vor.u32 %v1537_v61, %v1534_v58  ;;  %p2355_p13 = pnand %p2354_p12, %p2501_p4  ;;  %p2362_p3 = por %p2361_p2, %p2360_p1 }
  0x59   : > { %2187 = vmatprep.mubr.msk.bf16.mxu0 %vm296_vm1, %v2005_v28  ;;  %v2007_v63 = vcombine.low %v1502_v56, %v1516_v62 }
  0x5a   : > { %v1524_v59 = vor.u32 %v1523_v53, %v1520_v51  ;;  %v1539_v6 = vrot.slane %v1538_v2, 4  ;;  %p2356_p0 = pneg %p2355_p13 }
  0x5c   : > { %2142 = vmatmul.mubr.msk.bf16.gmra.mrb[4].mxu1 %vm296_vm1, %v2350_v32  ;;  %v1525_v0 = vrot.slane %v1524_v59, 4  ;;  %v1544_v7 = vsel %vm2586_vm4, %v1539_v6, %v1543_v4  ;;  %p2363_p5 = pnand %p2362_p3, %p2356_p0 }
  0x5d   : > { %2151 = vmatprep.mubr.msk.bf16.mxu1 %vm296_vm1, %v2351_v15 }
  0x5e   : > { %v1530_v5 = vsel %vm2586_vm4, %v1525_v0, %v1529_v60 }
  0x5f   : > { %v2008_v9 = vcombine.low %v1530_v5, %v1544_v7 }
  0x60   : > { %2188 = vmatmul.mubr.msk.bf16.vlgmr.msra.gmra.mrb[0].mxu0 %vm296_vm1, %v2006_v46 }
  0x61   : > { %2191 = vmatprep.mubr.msk.bf16.mxu0 %vm296_vm1, %v2007_v63 }
  0x68   : > { %2192 = vmatmul.mubr.msk.bf16.gmra.mrb[4].mxu0 %vm296_vm1, %v2008_v9  ;;  %2152 = vmatmul.mubr.msk.bf16.vlgmr.msra.gmra.mrb[4].mxu1 %vm296_vm1, %v2352_v8 }
 0x127   : > { %v2139_v11 = vpop.f32.mrb[0].mxu1 }
 0x128   : > { %v791_v12 = vpop.f32.mrb[1].mxu1 }
 0x129   : > { %v2140_v13 = vpop.f32.mrb[2].mxu1 }
 0x12a   : > { %v794_v14 = vpop.f32.mrb[3].mxu1 }
 0x133   : > { %v2189_v17 = vpop.f32.mrb[0].mxu0 }
 0x134   : > { %v2197_v19 = vadd.f32 %v2189_v17, %v2139_v11  ;;  %v1608_v44 = vpop.f32.mrb[1].mxu0 }
 0x135   : > { %v2198_v21 = vadd.f32 %v1608_v44, %v791_v12  ;;  %v2190_v22 = vpop.f32.mrb[2].mxu0 }
 0x136   : > { %v1656_v24 = vmul.f32 %v2197_v19, %v2013_v18  ;;  %v2199_v25 = vadd.f32 %v2190_v22, %v2140_v13  ;;  %v1611_v26 = vpop.f32.mrb[3].mxu0 }
 0x137   : > { %v1654_v27 = vmul.f32 %v2198_v21, %v2013_v18  ;;  %v2200_v28 = vadd.f32 %v1611_v26, %v794_v14 }
 0x138   : > { %v1671_v29 = vadd.f32 %v2014_v20, %v1656_v24  ;;  %v1657_v30 = vmul.f32 %v2199_v25, %v2013_v18 }
 0x139   : > { %v1669_v31 = vadd.f32 %v2014_v20, %v1654_v27  ;;  %v1655_v32 = vmul.f32 %v2200_v28, %v2013_v18 }
 0x13a   : > { %v1672_v1 = vadd.f32 %v2014_v20, %v1657_v30  ;;  %v1679_v34 = vmax.f32 %v1671_v29, 0.0 }
 0x13b   : > { %v1670_v33 = vadd.f32 %v2014_v20, %v1655_v32  ;;  %v1677_v36 = vmax.f32 %v1669_v31, 0.0  ;;  %v2193_v37 = vpop.f32.mrb[4].mxu0  ;;  %v2153_v40 = vpop.f32.mrb[4].mxu1 }
 0x13c   : > { %v1680_v35 = vmax.f32 %v1672_v1, 0.0  ;;  %v1624_v39 = vpop.f32.mrb[5].mxu0  ;;  %v2201_v42 = vadd.f32 %v2193_v37, %v2153_v40  ;;  %v926_v43 = vpop.f32.mrb[5].mxu1 }
 0x13d   : > { %v1678_v3 = vmax.f32 %v1670_v33, 0.0  ;;  %v2194_v41 = vpop.f32.mrb[6].mxu0  ;;  %v2202_v23 = vadd.f32 %v1624_v39, %v926_v43  ;;  %v2154_v46 = vpop.f32.mrb[6].mxu1 }
 0x13e   : > { %v2045_v38 = vpack.c.bf16 %v1680_v35, %v1679_v34  ;;  %v1627_v45 = vpop.f32.mrb[7].mxu0  ;;  %v1660_v15 = vmul.f32 %v2201_v42, %v2013_v18  ;;  %v2203_v47 = vadd.f32 %v2194_v41, %v2154_v46  ;;  %v929_v48 = vpop.f32.mrb[7].mxu1 }
 0x13f   : > { %v2040_v16 = vpack.c.bf16 %v1678_v3, %v1677_v36  ;;  %v1658_v49 = vmul.f32 %v2202_v23, %v2013_v18  ;;  %v2204_v10 = vadd.f32 %v1627_v45, %v929_v48 }
 0x140   : > { %2057 = vst [vmem:[%s239_s22 + $0x8] sm:$0xff] %v2045_v38   ;;  %v1675_v50 = vadd.f32 %v2014_v20, %v1660_v15  ;;  %v1661_v51 = vmul.f32 %v2203_v47, %v2013_v18 }
 0x141   : > { %2041 = vst [vmem:[%s239_s22] sm:$0xff] %v2040_v16   ;;  %v1673_v52 = vadd.f32 %v2014_v20, %v1658_v49  ;;  %v1659_v53 = vmul.f32 %v2204_v10, %v2013_v18 }
 0x142   : > { %v1676_v54 = vadd.f32 %v2014_v20, %v1661_v51  ;;  %v1683_v56 = vmax.f32 %v1675_v50, 0.0 }
 0x143   : > { %v1674_v55 = vadd.f32 %v2014_v20, %v1659_v53  ;;  %v1681_v58 = vmax.f32 %v1673_v52, 0.0 }
 0x144   : > { %v1684_v57 = vmax.f32 %v1676_v54, 0.0 }
 0x145   : > { %v1682_v59 = vmax.f32 %v1674_v55, 0.0 }
 0x146   : > { %v2055_v60 = vpack.c.bf16 %v1684_v57, %v1683_v56 }
 0x147   : > { %v2050_v61 = vpack.c.bf16 %v1682_v59, %v1681_v58 }
 0x148   : > { %2059 = vst [vmem:[%s239_s22 + $0x18] sm:$0xff] %v2055_v60  }
 0x149   : > { %2058 = vst [vmem:[%s239_s22 + $0x10] sm:$0xff] %v2050_v61  }
 0x14a   : > { %2366 = shalt.err (!%p2363_p5)
}
 0x14b   : > { %s2367_s10 = scalar_lea.hbm %s2771_s5, 512  ;;  %s2371_s13 = scalar_lea.hbm %s2827_s4, 1024 }
 0x14c   : > { %p2368_p6 = scmp.ne.s32.totalorder %s2771_s5, %s2367_s10  ;;  %p2372_p10 = scmp.lt.u32.totalorder %s2771_s5, %s2827_s4 }
 0x14d   : > { %p2373_p11 = scmp.lt.u32.totalorder %s2371_s13, %s2367_s10  ;;  %p2375_p13 = scmp.lt.u32.totalorder %s2367_s10, %s2771_s5 }
 0x14e   : > { %p2369_p7 = pnand %p2368_p6, %p2501_p4 }
 0x14f   : > { %p2374_p12 = por %p2373_p11, %p2372_p10 }
 0x150   : > { %p2370_p9 = pneg %p2369_p7 }
 0x151   : > { %p2376_p0 = por %p2375_p13, %p2374_p12 }
 0x153   : > { %p2377_p1 = pnand %p2376_p0, %p2370_p9 }
 0x155   : > { %2380 = shalt.err (!%p2377_p1)
}
 0x156   : > { %s2434_s22 = smov 64   ;;  %s2435_s24 = smov 4  }
 0x157   : > { %2272 = dma.vmem_to_hbm [thread:$0]  (%p2501_p4), %s2773_s26, 512, %s2771_s5, %s2777_s18, %s2434_s22, %s2434_s22, %s2435_s24  }
 0x158 PF: > { %p2278_p2 = scmp.ge.s32.totalorder %s2431_s20, 2  ;;  %s1755_s29 = sand.u32 1, %s2411_s15  }
 0x159   : > { %s1756_s30 = scalar_lea.sflag [#allocation3], %s1755_s29 }
 0x15a   : > { %p2275_p3 = pnand %p2278_p2, %p2508_p8 }
 0x15c   : > { %2406 = dma.done.wait (!%p2275_p3), %s1756_s30, 512  }
 0x15d   : > { %2408 = vsyncadd (!%p2275_p3), %s1756_s30, 4294966784  ;;  %s17_s20 = sadd.s32 1, %s2431_s20   ;;  %s2832_s15 = smov %s2415_s16 }
 0x15e   : > { %p14_p5 = scmp.ge.s32.totalorder %s17_s20, 4   ;;  %s2833_s16 = smov %s2419_s17 }
 0x15f   : > { %s2834_s17 = smov %s2514_s28  ;;  %s2835_s18 = smov %s2427_s19 }
 0x160   : > { %s2836_s19 = smov %s2838_s23  ;;  %16 = sbr.rel (!%p14_p5) target bundleno = 4 (0x4), region = 93 }
 0x167   :  { %1761 = vsyncpa [#allocation3], 1 }
 0x168   :  { %1763 = vsyncpa [#allocation3 + $0x1], 1 }

</bundles_post_ra>
